<compile_context>
chip_gen: v5e
topology: v5e:2x2
jax: 0.10.0
libtpu: 0.0.40
codegen_flags: <defaults>
</compile_context>

<pallas_src>
import jax
import jax.numpy as jnp
from jax.experimental import pallas as pl
from jax.experimental.pallas import tpu as pltpu


def _voxel_gating_fusion_kernel(
    f0_ref, f1_ref, f2_ref,   # (1, C, tn) feature tiles (io dtype, e.g. bf16)
    wg_ref, bg_ref,           # stacked gate MLPs: (3, 3, C), (3, 3, 1)  f32
    wf_ref, bf_ref,           # fuse MLP: (C, C), (C, 1)                 f32
    out_ref,                  # (1, C, tn)
):
    # Upcast once per tile; all internal math stays f32 (v5e has no bf16 VPU/EUP).
    f0 = f0_ref[0].astype(jnp.float32)    # (C, tn)
    f1 = f1_ref[0].astype(jnp.float32)
    f2 = f2_ref[0].astype(jnp.float32)

    def gate(i, x):
        # SharedMLP_Voxel == 1x1 Conv1d over channels + ReLU, then sigmoid.
        y = jnp.dot(wg_ref[i], x, preferred_element_type=jnp.float32)
        y = jnp.maximum(y + bg_ref[i], 0.0)
        return jax.nn.sigmoid(y)          # (3, tn)

    # Sum of per-scale sigmoid gates.
    gates_sum = gate(0, f0) + gate(1, f1) + gate(2, f2)       # (3, tn)

    # Softmax over the 3 gate channels (sublane axis).
    g_max = jnp.max(gates_sum, axis=0, keepdims=True)
    e = jnp.exp(gates_sum - g_max)
    sm = e / jnp.sum(e, axis=0, keepdims=True)                # (3, tn)

    # Gated fusion of the three scales.
    fuse = sm[0:1, :] * f0 + sm[1:2, :] * f1 + sm[2:3, :] * f2  # (C, tn)

    # Final shared MLP (1x1 conv + ReLU).
    out = jnp.dot(wf_ref[...], fuse, preferred_element_type=jnp.float32)
    out = jnp.maximum(out + bf_ref[...], 0.0)                 # (C, tn)
    out_ref[0] = out.astype(out_ref.dtype)


def voxel_gating_fusion(features, params, *, tn=1024, io_dtype=jnp.bfloat16):
    """features: list of 3 arrays of shape (B, C, H, W, D)."""
    B, C, H, W, D = features[0].shape
    N = H * W * D

    # Pick a large lane tile: multiple of 128, no bigger than (128-padded) N.
    n_pad128 = pl.cdiv(N, 128) * 128
    tn = max(128, (min(tn, n_pad128) // 128) * 128)
    N_pad = pl.cdiv(N, tn) * tn

    # Flatten to (B, C, N), cast HBM-side dtype, pad lane axis if needed.
    flat = []
    for f in features:
        x = f.reshape(B, C, N).astype(io_dtype)
        if N_pad != N:
            x = jnp.pad(x, ((0, 0), (0, 0), (0, N_pad - N)))
        flat.append(x)

    # Consolidate the three gate MLPs into single stacked weight/bias arrays.
    wg = jnp.stack([params["gate_w"][i] for i in range(3)]).astype(jnp.float32)  # (3,3,C)
    bg = jnp.stack([params["gate_b"][i] for i in range(3)]).astype(jnp.float32)  # (3,3,1)
    wf = params["fuse_w"].astype(jnp.float32)                                    # (C,C)
    bf = params["fuse_b"].astype(jnp.float32)                                    # (C,1)

    feat_spec = pl.BlockSpec((1, C, tn), lambda b, n: (b, 0, n))
    full_spec = lambda shape: pl.BlockSpec(shape, lambda b, n: (0,) * len(shape))

    out = pl.pallas_call(
        _voxel_gating_fusion_kernel,
        out_shape=jax.ShapeDtypeStruct((B, C, N_pad), io_dtype),
        grid_spec=pl.GridSpec(
            grid=(B, N_pad // tn),
            in_specs=[
                feat_spec, feat_spec, feat_spec,
                full_spec((3, 3, C)), full_spec((3, 3, 1)),
                full_spec((C, C)), full_spec((C, 1)),
            ],
            out_specs=feat_spec,
        ),
        compiler_params=pltpu.CompilerParams(
            dimension_semantics=("parallel", "parallel")),
    )(flat[0], flat[1], flat[2], wg, bg, wf, bf)

    if N_pad != N:
        out = out[:, :, :N]
    return out.reshape(B, C, H, W, D)


def _reference(features, params):
    """Pure-JAX reference matching the PyTorch forward semantics (f32 math)."""
    B, C, H, W, D = features[0].shape
    N = H * W * D
    flat = [f.reshape(B, C, N).astype(jnp.float32) for f in features]

    def mlp(w, b, x):  # (O,C) @ (B,C,N) + (O,1) -> (B,O,N), ReLU
        return jnp.maximum(jnp.einsum("oc,bcn->bon", w, x) + b[None], 0.0)

    gates = [
        jax.nn.sigmoid(mlp(params["gate_w"][i], params["gate_b"][i], flat[i]))
        for i in range(3)
    ]
    gates_sum = gates[0] + gates[1] + gates[2]            # (B, 3, N)
    sm = jax.nn.softmax(gates_sum, axis=1)                # softmax over gate dim
    fuse = (sm[:, 0:1, :] * flat[0]
            + sm[:, 1:2, :] * flat[1]
            + sm[:, 2:3, :] * flat[2])                    # (B, C, N)
    out = mlp(params["fuse_w"], params["fuse_b"], fuse)   # (B, C, N)
    return out.reshape(B, C, H, W, D)


if __name__ == "__main__":
    key = jax.random.PRNGKey(0)
    B, C, H, W, D = 2, 32, 8, 8, 4          # N = H*W*D = 256
    n_scales = 3

    keys = jax.random.split(key, 16)
    feats = [
        jax.random.normal(keys[i], (B, C, H, W, D), dtype=jnp.float32)
        for i in range(n_scales)
    ]

    # Deterministic synthetic parameters (Conv1d k=1 weights/biases).
    params = {
        "gate_w": [
            0.1 * jax.random.normal(keys[3 + i], (3, C), dtype=jnp.float32)
            for i in range(n_scales)
        ],
        "gate_b": [
            0.1 * jax.random.normal(keys[6 + i], (3, 1), dtype=jnp.float32)
            for i in range(n_scales)
        ],
        "fuse_w": 0.1 * jax.random.normal(keys[9], (C, C), dtype=jnp.float32),
        "fuse_b": 0.1 * jax.random.normal(keys[10], (C, 1), dtype=jnp.float32),
    }

    out = voxel_gating_fusion(feats, params)
    out = jax.block_until_ready(out)
    assert out.shape == (B, C, H, W, D)

    # Reference on the same bf16-quantized inputs (HBM-side dtype of the kernel).
    feats_q = [f.astype(jnp.bfloat16).astype(jnp.float32) for f in feats]
    ref = _reference(feats_q, params)
    assert jnp.allclose(out.astype(jnp.float32), ref, atol=3e-2, rtol=3e-2), \
        "mismatch vs reference"

    print("KERNEL_OK")
</pallas_src>

<mosaic_0001>
module attributes {stable_mosaic.version = 11 : i64} {
  func.func @_voxel_gating_fusion_kernel(%arg0: i32, %arg1: i32, %arg2: memref<1x32x256xbf16, #tpu.memory_space<vmem>>, %arg3: memref<1x32x256xbf16, #tpu.memory_space<vmem>>, %arg4: memref<1x32x256xbf16, #tpu.memory_space<vmem>>, %arg5: memref<3x3x32xf32, #tpu.memory_space<vmem>>, %arg6: memref<3x3x1xf32, #tpu.memory_space<vmem>>, %arg7: memref<32x32xf32, #tpu.memory_space<vmem>>, %arg8: memref<32x1xf32, #tpu.memory_space<vmem>>, %arg9: memref<1x32x256xbf16, #tpu.memory_space<vmem>>) attributes {dimension_semantics = [#tpu.dimension_semantics<parallel>, #tpu.dimension_semantics<parallel>], iteration_bounds = array<i64: 2, 1>, scalar_prefetch = 0 : i64, scratch_operands = 0 : i64, tpu.core_type = #tpu.core_type<tc>, window_params = [{transform_indices = @transform_0, window_bounds = array<i64: 1, 32, 256>}, {transform_indices = @transform_1, window_bounds = array<i64: 1, 32, 256>}, {transform_indices = @transform_2, window_bounds = array<i64: 1, 32, 256>}, {pipeline_mode = #tpu.pipeline_mode<synchronous>, transform_indices = @transform_3, window_bounds = array<i64: 3, 3, 32>}, {pipeline_mode = #tpu.pipeline_mode<synchronous>, transform_indices = @transform_4, window_bounds = array<i64: 3, 3, 1>}, {pipeline_mode = #tpu.pipeline_mode<synchronous>, transform_indices = @transform_5, window_bounds = array<i64: 32, 32>}, {pipeline_mode = #tpu.pipeline_mode<synchronous>, transform_indices = @transform_6, window_bounds = array<i64: 32, 1>}, {transform_indices = @transform_7, window_bounds = array<i64: 1, 32, 256>}]} {
    %c0 = arith.constant 0 : index
    %c0_0 = arith.constant 0 : index
    %c0_1 = arith.constant 0 : index
    %0 = vector.load %arg2[%c0, %c0_0, %c0_1] : memref<1x32x256xbf16, #tpu.memory_space<vmem>>, vector<1x32x256xbf16>
    %1 = vector.shape_cast %0 : vector<1x32x256xbf16> to vector<32x256xbf16>
    %2 = arith.extf %1 : vector<32x256xbf16> to vector<32x256xf32>
    %c0_2 = arith.constant 0 : index
    %c0_3 = arith.constant 0 : index
    %c0_4 = arith.constant 0 : index
    %3 = vector.load %arg3[%c0_2, %c0_3, %c0_4] : memref<1x32x256xbf16, #tpu.memory_space<vmem>>, vector<1x32x256xbf16>
    %4 = vector.shape_cast %3 : vector<1x32x256xbf16> to vector<32x256xbf16>
    %5 = arith.extf %4 : vector<32x256xbf16> to vector<32x256xf32>
    %c0_5 = arith.constant 0 : index
    %c0_6 = arith.constant 0 : index
    %c0_7 = arith.constant 0 : index
    %6 = vector.load %arg4[%c0_5, %c0_6, %c0_7] : memref<1x32x256xbf16, #tpu.memory_space<vmem>>, vector<1x32x256xbf16>
    %7 = vector.shape_cast %6 : vector<1x32x256xbf16> to vector<32x256xbf16>
    %8 = arith.extf %7 : vector<32x256xbf16> to vector<32x256xf32>
    %c0_8 = arith.constant 0 : index
    %c0_9 = arith.constant 0 : index
    %c0_10 = arith.constant 0 : index
    %9 = vector.load %arg5[%c0_8, %c0_9, %c0_10] : memref<3x3x32xf32, #tpu.memory_space<vmem>>, vector<1x3x32xf32>
    %10 = vector.shape_cast %9 : vector<1x3x32xf32> to vector<3x32xf32>
    %cst = arith.constant dense<0.000000e+00> : vector<3x256xf32>
    %11 = tpu.matmul %10, %2, %cst {dimension_numbers = #tpu.dot_dimension_numbers<[1], [0], [0], [1], [0, 0, 1, 1], [], []>} : vector<3x32xf32>, vector<32x256xf32>, vector<3x256xf32> -> vector<3x256xf32>
    %c0_11 = arith.constant 0 : index
    %c0_12 = arith.constant 0 : index
    %c0_13 = arith.constant 0 : index
    %12 = vector.load %arg6[%c0_11, %c0_12, %c0_13] : memref<3x3x1xf32, #tpu.memory_space<vmem>>, vector<1x3x1xf32>
    %13 = vector.shape_cast %12 : vector<1x3x1xf32> to vector<3x1xf32>
    %14 = vector.broadcast %13 : vector<3x1xf32> to vector<3x256xf32>
    %15 = arith.addf %11, %14 : vector<3x256xf32>
    %cst_14 = arith.constant 0.000000e+00 : f32
    %16 = vector.broadcast %cst_14 : f32 to vector<3x256xf32>
    %17 = arith.maximumf %15, %16 : vector<3x256xf32>
    %18 = arith.negf %17 : vector<3x256xf32>
    %19 = math.exp %18 : vector<3x256xf32>
    %cst_15 = arith.constant 1.000000e+00 : f32
    %20 = vector.broadcast %cst_15 : f32 to vector<3x256xf32>
    %21 = arith.addf %20, %19 : vector<3x256xf32>
    %22 = arith.divf %20, %21 : vector<3x256xf32>
    %c1 = arith.constant 1 : index
    %c0_16 = arith.constant 0 : index
    %c0_17 = arith.constant 0 : index
    %23 = vector.load %arg5[%c1, %c0_16, %c0_17] : memref<3x3x32xf32, #tpu.memory_space<vmem>>, vector<1x3x32xf32>
    %24 = vector.shape_cast %23 : vector<1x3x32xf32> to vector<3x32xf32>
    %cst_18 = arith.constant dense<0.000000e+00> : vector<3x256xf32>
    %25 = tpu.matmul %24, %5, %cst_18 {dimension_numbers = #tpu.dot_dimension_numbers<[1], [0], [0], [1], [0, 0, 1, 1], [], []>} : vector<3x32xf32>, vector<32x256xf32>, vector<3x256xf32> -> vector<3x256xf32>
    %c1_19 = arith.constant 1 : index
    %c0_20 = arith.constant 0 : index
    %c0_21 = arith.constant 0 : index
    %26 = vector.load %arg6[%c1_19, %c0_20, %c0_21] : memref<3x3x1xf32, #tpu.memory_space<vmem>>, vector<1x3x1xf32>
    %27 = vector.shape_cast %26 : vector<1x3x1xf32> to vector<3x1xf32>
    %28 = vector.broadcast %27 : vector<3x1xf32> to vector<3x256xf32>
    %29 = arith.addf %25, %28 : vector<3x256xf32>
    %cst_22 = arith.constant 0.000000e+00 : f32
    %30 = vector.broadcast %cst_22 : f32 to vector<3x256xf32>
    %31 = arith.maximumf %29, %30 : vector<3x256xf32>
    %32 = arith.negf %31 : vector<3x256xf32>
    %33 = math.exp %32 : vector<3x256xf32>
    %cst_23 = arith.constant 1.000000e+00 : f32
    %34 = vector.broadcast %cst_23 : f32 to vector<3x256xf32>
    %35 = arith.addf %34, %33 : vector<3x256xf32>
    %36 = arith.divf %34, %35 : vector<3x256xf32>
    %37 = arith.addf %22, %36 : vector<3x256xf32>
    %c2 = arith.constant 2 : index
    %c0_24 = arith.constant 0 : index
    %c0_25 = arith.constant 0 : index
    %38 = vector.load %arg5[%c2, %c0_24, %c0_25] : memref<3x3x32xf32, #tpu.memory_space<vmem>>, vector<1x3x32xf32>
    %39 = vector.shape_cast %38 : vector<1x3x32xf32> to vector<3x32xf32>
    %cst_26 = arith.constant dense<0.000000e+00> : vector<3x256xf32>
    %40 = tpu.matmul %39, %8, %cst_26 {dimension_numbers = #tpu.dot_dimension_numbers<[1], [0], [0], [1], [0, 0, 1, 1], [], []>} : vector<3x32xf32>, vector<32x256xf32>, vector<3x256xf32> -> vector<3x256xf32>
    %c2_27 = arith.constant 2 : index
    %c0_28 = arith.constant 0 : index
    %c0_29 = arith.constant 0 : index
    %41 = vector.load %arg6[%c2_27, %c0_28, %c0_29] : memref<3x3x1xf32, #tpu.memory_space<vmem>>, vector<1x3x1xf32>
    %42 = vector.shape_cast %41 : vector<1x3x1xf32> to vector<3x1xf32>
    %43 = vector.broadcast %42 : vector<3x1xf32> to vector<3x256xf32>
    %44 = arith.addf %40, %43 : vector<3x256xf32>
    %cst_30 = arith.constant 0.000000e+00 : f32
    %45 = vector.broadcast %cst_30 : f32 to vector<3x256xf32>
    %46 = arith.maximumf %44, %45 : vector<3x256xf32>
    %47 = arith.negf %46 : vector<3x256xf32>
    %48 = math.exp %47 : vector<3x256xf32>
    %cst_31 = arith.constant 1.000000e+00 : f32
    %49 = vector.broadcast %cst_31 : f32 to vector<3x256xf32>
    %50 = arith.addf %49, %48 : vector<3x256xf32>
    %51 = arith.divf %49, %50 : vector<3x256xf32>
    %52 = arith.addf %37, %51 : vector<3x256xf32>
    %cst_32 = arith.constant dense<0xFF800000> : vector<256xf32>
    %53 = vector.multi_reduction <maximumf>, %52, %cst_32 [0] : vector<3x256xf32> to vector<256xf32>
    %54 = vector.shape_cast %53 : vector<256xf32> to vector<1x256xf32>
    %55 = vector.broadcast %54 : vector<1x256xf32> to vector<3x256xf32>
    %56 = arith.subf %52, %55 : vector<3x256xf32>
    %57 = math.exp %56 : vector<3x256xf32>
    %cst_33 = arith.constant dense<0.000000e+00> : vector<256xf32>
    %58 = vector.multi_reduction <add>, %57, %cst_33 [0] : vector<3x256xf32> to vector<256xf32>
    %59 = vector.shape_cast %58 : vector<256xf32> to vector<1x256xf32>
    %60 = vector.broadcast %59 : vector<1x256xf32> to vector<3x256xf32>
    %61 = arith.divf %57, %60 : vector<3x256xf32>
    %62 = vector.extract_strided_slice %61 {offsets = [0, 0], sizes = [1, 256], strides = [1, 1]} : vector<3x256xf32> to vector<1x256xf32>
    %63 = vector.broadcast %62 : vector<1x256xf32> to vector<32x256xf32>
    %64 = arith.mulf %63, %2 : vector<32x256xf32>
    %65 = vector.extract_strided_slice %61 {offsets = [1, 0], sizes = [1, 256], strides = [1, 1]} : vector<3x256xf32> to vector<1x256xf32>
    %66 = vector.broadcast %65 : vector<1x256xf32> to vector<32x256xf32>
    %67 = arith.mulf %66, %5 : vector<32x256xf32>
    %68 = arith.addf %64, %67 : vector<32x256xf32>
    %69 = vector.extract_strided_slice %61 {offsets = [2, 0], sizes = [1, 256], strides = [1, 1]} : vector<3x256xf32> to vector<1x256xf32>
    %70 = vector.broadcast %69 : vector<1x256xf32> to vector<32x256xf32>
    %71 = arith.mulf %70, %8 : vector<32x256xf32>
    %72 = arith.addf %68, %71 : vector<32x256xf32>
    %c0_34 = arith.constant 0 : index
    %c0_35 = arith.constant 0 : index
    %73 = vector.load %arg7[%c0_34, %c0_35] : memref<32x32xf32, #tpu.memory_space<vmem>>, vector<32x32xf32>
    %cst_36 = arith.constant dense<0.000000e+00> : vector<32x256xf32>
    %74 = tpu.matmul %73, %72, %cst_36 {dimension_numbers = #tpu.dot_dimension_numbers<[1], [0], [0], [1], [0, 0, 1, 1], [], []>} : vector<32x32xf32>, vector<32x256xf32>, vector<32x256xf32> -> vector<32x256xf32>
    %c0_37 = arith.constant 0 : index
    %c0_38 = arith.constant 0 : index
    %75 = vector.load %arg8[%c0_37, %c0_38] : memref<32x1xf32, #tpu.memory_space<vmem>>, vector<32x1xf32>
    %76 = vector.broadcast %75 : vector<32x1xf32> to vector<32x256xf32>
    %77 = arith.addf %74, %76 : vector<32x256xf32>
    %cst_39 = arith.constant 0.000000e+00 : f32
    %78 = vector.broadcast %cst_39 : f32 to vector<32x256xf32>
    %79 = arith.maximumf %77, %78 : vector<32x256xf32>
    %80 = arith.truncf %79 : vector<32x256xf32> to vector<32x256xbf16>
    %c0_40 = arith.constant 0 : index
    %c0_41 = arith.constant 0 : index
    %c0_42 = arith.constant 0 : index
    %81 = vector.load %arg9[%c0_40, %c0_41, %c0_42] : memref<1x32x256xbf16, #tpu.memory_space<vmem>>, vector<1x32x256xbf16>
    %82 = vector.shape_cast %81 : vector<1x32x256xbf16> to vector<32x256xbf16>
    %83 = vector.shape_cast %80 : vector<32x256xbf16> to vector<1x32x256xbf16>
    tpu.vector_store %arg9[%c0_40, %c0_41, %c0_42], %83 {strides = array<i32>} : memref<1x32x256xbf16, #tpu.memory_space<vmem>>, vector<1x32x256xbf16>,
    return
  }
  func.func @transform_0(%arg0: i32, %arg1: i32) -> (i32, i32, i32) {
    %c0_i32 = arith.constant 0 : i32
    %c0_i32_0 = arith.constant 0 : i32
    return %arg0, %c0_i32, %arg1 : i32, i32, i32
  }
  func.func @transform_1(%arg0: i32, %arg1: i32) -> (i32, i32, i32) {
    %c0_i32 = arith.constant 0 : i32
    %c0_i32_0 = arith.constant 0 : i32
    return %arg0, %c0_i32, %arg1 : i32, i32, i32
  }
  func.func @transform_2(%arg0: i32, %arg1: i32) -> (i32, i32, i32) {
    %c0_i32 = arith.constant 0 : i32
    %c0_i32_0 = arith.constant 0 : i32
    return %arg0, %c0_i32, %arg1 : i32, i32, i32
  }
  func.func @transform_3(%arg0: i32, %arg1: i32) -> (i32, i32, i32) {
    %c0_i32 = arith.constant 0 : i32
    %c0_i32_0 = arith.constant 0 : i32
    %c0_i32_1 = arith.constant 0 : i32
    %c0_i32_2 = arith.constant 0 : i32
    return %c0_i32, %c0_i32_0, %c0_i32_1 : i32, i32, i32
  }
  func.func @transform_4(%arg0: i32, %arg1: i32) -> (i32, i32, i32) {
    %c0_i32 = arith.constant 0 : i32
    %c0_i32_0 = arith.constant 0 : i32
    %c0_i32_1 = arith.constant 0 : i32
    %c0_i32_2 = arith.constant 0 : i32
    return %c0_i32, %c0_i32_0, %c0_i32_1 : i32, i32, i32
  }
  func.func @transform_5(%arg0: i32, %arg1: i32) -> (i32, i32) {
    %c0_i32 = arith.constant 0 : i32
    %c0_i32_0 = arith.constant 0 : i32
    %c0_i32_1 = arith.constant 0 : i32
    return %c0_i32, %c0_i32_0 : i32, i32
  }
  func.func @transform_6(%arg0: i32, %arg1: i32) -> (i32, i32) {
    %c0_i32 = arith.constant 0 : i32
    %c0_i32_0 = arith.constant 0 : i32
    %c0_i32_1 = arith.constant 0 : i32
    return %c0_i32, %c0_i32_0 : i32, i32
  }
  func.func @transform_7(%arg0: i32, %arg1: i32) -> (i32, i32, i32) {
    %c0_i32 = arith.constant 0 : i32
    %c0_i32_0 = arith.constant 0 : i32
    return %arg0, %c0_i32, %arg1 : i32, i32, i32
  }
}

</mosaic_0001>

<bundles_post_ra>
// kernel: tpu_custom_call.1
= control target key start
LH: loop header
LB: loop body
LE: loop exit
PB: predicated region body
PF: predicated region fallthrough
CT: control target
= control target key end

     0   :  { %s1979_s0 = inlined_call_operand.hbm [shape: bf16[2,32,256], index: 0, kind: input, shape index: {}]   ;;  %s1980_s1 = inlined_call_operand.hbm [shape: bf16[2,32,256], index: 1, kind: input, shape index: {}]   ;;  %s1981_s2 = inlined_call_operand.hbm [shape: bf16[2,32,256], index: 2, kind: input, shape index: {}]   ;;  %s1982_s3 = inlined_call_operand.vmem [shape: f32[3,3,32], index: 3, kind: input, shape index: {}]   ;;  %s1983_s4 = inlined_call_operand.vmem [shape: f32[3,3,1], index: 4, kind: input, shape index: {}]   ;;  %s1984_s5 = inlined_call_operand.vmem [shape: f32[32,32], index: 5, kind: input, shape index: {}]   ;;  %s1985_s6 = inlined_call_operand.vmem [shape: f32[32,1], index: 6, kind: input, shape index: {}]   ;;  %s1986_s7 = inlined_call_operand.hbm [shape: bf16[2,32,256], index: 7, kind: output, shape index: {}]  }
   0x1   :  { %2001 = sst [smem:[#allocation20_spill]] %s1980_s1 }
   0x2   :  { %2002 = sst [smem:[#allocation21_spill]] %s1986_s7 }
   0x3   :  { %12 = vsyncpa [#allocation3], 0 }
   0x4   :  { %14 = vsyncpa [#allocation3 + $0x1], 0 }
   0x5   :  { %15 = vsyncpa [#allocation6], 0 }
   0x6   :  { %17 = vsyncpa [#allocation6 + $0x1], 0 }
   0x7   :  { %18 = vsyncpa [#allocation4], 0 }
   0x8   :  { %20 = vsyncpa [#allocation4 + $0x1], 0  ;;  %s1490_s24 = smov 0   ;;  %s1492_s25 = smov 0  }
   0x9   :  { %s1494_s26 = smov 0   ;;  %s1496_s27 = smov 0  }
   0xa   :  { %s1498_s28 = smov 0   ;;  %s1500_s29 = smov 0  }
   0xb LB: > { %2003 = sst [smem:[#allocation12_spill]] %s1423_s24  ;;  %s1521_s30 = sadd.s32 4294967295, %s1443_s29   ;;  %s1443_s29 = sphi %s1500_s29, %s26_s29   ;;  %s1439_s28 = sphi %s1498_s28, %s2046_s28   ;;  %s1435_s27 = sphi %s1496_s27, %s2045_s27   ;;  %s1431_s26 = sphi %s1494_s26, %s2044_s26   ;;  %s1427_s25 = sphi %s1492_s25, %s2048_s25   ;;  %s1423_s24 = sphi %s1490_s24, %s2047_s24  }
   0xc   : > { %2004 = sst [smem:[#allocation13_spill]] %s1431_s26  ;;  %s1105_s8 = sadd.s32 4294967294, %s1443_s29  }
   0xd   : > { %2005 = sst [smem:[#allocation14_spill]] %s1439_s28  ;;  %s38_s9 = sadd.s32 1, %s1439_s28 }
   0xe   : > { %2006 = sst [smem:[#allocation15_spill]] %s1443_s29  ;;  %s47_s10 = sadd.s32 1, %s1431_s26 }
   0xf   : > { %p40_p0 = scmp.ge.s32.totalorder %s38_s9, 2  ;;  %p54_p1 = scmp.ne.s32.totalorder %s1431_s26, %s1427_s25 }
  0x10   : > { %p55_p2 = scmp.eq.s32.totalorder %s1443_s29, 0  ;;  %p60_p3 = scmp.ne.s32.totalorder %s1427_s25, %s1423_s24 }
  0x11   : > { %s2050_s9 = smov (%p40_p0, %s38_s9), 0  ;;  %p61_p5 = scmp.eq.s32.totalorder %s1521_s30, 0 }
  0x12   : > { %2007 = sst [smem:[#allocation16_spill]] %s2050_s9  ;;  %p1533_p4 = por %p55_p2, %p54_p1 }
  0x13   : > { %s42_s12 = ssub.s32 %s1439_s28, %s2050_s9  ;;  %p226_p6 = scmp.eq.s32.totalorder %s1521_s30, 1 }
  0x14   : > { %p45_p7 = scmp.eq.s32.totalorder %s42_s12, 0  ;;  %p1541_p8 = por %p61_p5, %p60_p3 }
  0x15   : > { %p1545_p9 = por %p226_p6, %p54_p1  ;;  %p232_p10 = scmp.eq.s32.totalorder %s1105_s8, 1 }
  0x16   : > { %s1550_s15 = scalar_select %p45_p7, %s1431_s26, %s47_s10  }
  0x17   : > { %s2010_s14 = scalar_select %p1545_p9, 1, 0 }
  0x18   : > { %2012 = sst [smem:[#allocation18_spill]] %s1550_s15  ;;  %p1552_p11 = por %p232_p10, %p60_p3 }
  0x19   : > { %2011 = sst [smem:[#allocation17_spill]] %s2010_s14  ;;  %p1107_p12 = scmp.ge.s32.totalorder %s1443_s29, 2 }
  0x1a   : > { %s2013_s16 = scalar_select %p1552_p11, 1, 0 }
  0x1b   : > { %p1177_p13 = scmp.lt.s32.totalorder %s1443_s29, 2  ;;  %s264_s17 = sand.u32 1, %s1431_s26  }
  0x1c   : > { %2014 = sst [smem:[#allocation19_spill]] %s2013_s16  ;;  %s1559_s18 = sshll.u32 %s264_s17, 5 }
  0x1d   : > { %s1151_s19 = sshll.u32 %s1439_s28, 5  ;;  %p1564_p0 = pnand %p1177_p13, %p1533_p4 }
  0x1e   : > { %s288_s21 = sand.u32 1, %s1443_s29   ;;  %s2016_s1 = sld [smem:[#allocation20_spill]] }
  0x1f   : > { %s292_s12 = scalar_lea.vmem [#allocation5], %s1559_s18  ;;  %s289_s15 = scalar_lea.sflag [#allocation6], %s288_s21 }
  0x20   : > { %s302_s9 = sshll.u32 %s292_s12, 4  ;;  %s1445_s28 = smov 128   ;;  %s303_s9 = int_to_ptr.vmem [resolvable:$true] %s302_s9 }
  0x21   : > { %s1446_s11 = smov 8   ;;  %p1117_p1 = scmp.ge.s32.totalorder %s1443_s29, 1 }
  0x22   : > { %p334_p2 = scmp.lt.s32.totalorder %s1443_s29, 3  ;;  %s265_s21 = scalar_lea.sflag [#allocation3], %s264_s17 }
  0x23   : > { %s323_s29 = scalar_lea.hbm %s1981_s2, %s1151_s19  ;;  %s316_s14 = scalar_lea.vmem [#allocation7], %s1559_s18 }
  0x24   : > { %s299_s8 = scalar_lea.hbm %s2016_s1, %s1151_s19  ;;  %p1577_p3 = pnand %p1117_p1, %p334_p2 }
  0x25   : > { %s300_s10 = sshll.u32 %s299_s8, 4  ;;  %s275_s8 = scalar_lea.hbm %s1979_s0, %s1151_s19  ;;  %s301_s10 = int_to_ptr.hbm [resolvable:$true] %s300_s10 }
  0x26   : > { %1169 = dma.hbm_to_vmem [thread:$0]  (!%p1564_p0), %s301_s10, 512, %s303_s9, %s289_s15, %s1445_s28, %s1445_s28, %s1446_s11  }
  0x27   : > { %s276_s12 = sshll.u32 %s275_s8, 4  ;;  %s268_s1 = scalar_lea.vmem [#allocation2], %s1559_s18  ;;  %s277_s12 = int_to_ptr.hbm [resolvable:$true] %s276_s12 }
  0x28   : > { %s278_s16 = sshll.u32 %s268_s1, 4  ;;  %s324_s24 = sshll.u32 %s323_s29, 4  ;;  %s279_s16 = int_to_ptr.vmem [resolvable:$true] %s278_s16  ;;  %s325_s24 = int_to_ptr.hbm [resolvable:$true] %s324_s24 }
  0x29   : > { %1166 = dma.hbm_to_vmem [thread:$0]  (!%p1564_p0), %s277_s12, 512, %s279_s16, %s265_s21, %s1445_s28, %s1445_s28, %s1446_s11  }
  0x2a   : > { %s326_s7 = sshll.u32 %s316_s14, 4  ;;  %338 = sbr.rel (%p1577_p3) target bundleno = 481 (0x1e1), region = 48  ;;  %s327_s7 = int_to_ptr.vmem [resolvable:$true] %s326_s7 }
  0x2b   : > { %1172 = dma.hbm_to_vmem [thread:$0]  (!%p1564_p0), %s325_s24, 512, %s327_s7, %s289_s15, %s1445_s28, %s1445_s28, %s1446_s11  }
  0x2c   : > { %s1596_s1 = sand.u32 (!%p1577_p3), 1, %s1427_s25  }
  0x2d   : > { %s1599_s16 = sshll.u32 (!%p1577_p3), %s1596_s1, 5  ;;  %s341_s17 = scalar_lea.sflag (!%p1577_p3), [#allocation3], %s1596_s1 }
  0x2e   : > { %s344_s29 = scalar_lea.vmem (!%p1577_p3), [#allocation2], %s1599_s16 }
  0x2f   : > { %1410 = dma.done.wait (%p1541_p8), %s341_s17, 512  }
  0x30   : > { %1412 = vsyncadd (%p1541_p8), %s341_s17, 4294966784  ;;  %s350_s7 = sand.u32 1, %s1521_s30   ;;  %s1609_s26 = scalar_lea.vmem [#allocation5], %s1599_s16 }
  0x31   : > { %s351_s24 = scalar_lea.sflag [#allocation6], %s350_s7 }
  0x32   : > { %1414 = dma.done.wait (%p1541_p8), %s351_s24, 1024  }
  0x33   : > { %1416 = vsyncadd (%p1541_p8), %s351_s24, 4294966272  ;;  %v1447_v0 = vmov 0   ;;  %v1615_v1 = vld [vmem:[%s344_s29 + $0x18] sm:$0xff]  ;;  %v1617_v2 = vld [vmem:[%s344_s29 + $0x10] sm:$0xff]  ;;  %vm453_vm0 = vcmask 261120   ;;  %s364_s11 = scalar_lea.vmem [#allocation7], %s1599_s16 }
  0x34   : > { %1232 = vset.pattern.permute.xlu0 %v1447_v0  ;;  %1233 = vset.pattern.permute.xlu1 %v1447_v0  ;;  %v1619_v3 = vld [vmem:[%s344_s29 + $0x8] sm:$0xff]  ;;  %v420_v4 = vunpack.c.l.bf16 %v1615_v1  ;;  %v421_v5 = vunpack.c.h.bf16 %v1615_v1  ;;  %v418_v6 = vunpack.c.l.bf16 %v1617_v2  ;;  %v419_v7 = vunpack.c.h.bf16 %v1617_v2  ;;  %v1625_v8 = vld [vmem:[%s344_s29] sm:$0xff]  ;;  %v1637_v12 = vld [vmem:[%s1609_s26 + $0x18] sm:$0xff]  ;;  %s2038_s8 = sld [smem:[#allocation21_spill]] }
  0x35   : > { %1234 = vset.pattern.permute.xlu2 %v1447_v0  ;;  %v447_v9 = vld [vmem:[%s1983_s4] sm:$0x7]  ;;  %v416_v10 = vunpack.c.l.bf16 %v1619_v3  ;;  %v417_v11 = vunpack.c.h.bf16 %v1619_v3  ;;  %v414_v13 = vunpack.c.l.bf16 %v1625_v8  ;;  %v2000_v14 = vunpack.c.h.bf16 %v1625_v8  ;;  %v1646_v15 = vld [vmem:[%s1609_s26 + $0x10] sm:$0xff]  ;;  %v1133_v16 = vld [vmem:[%s1983_s4 + $0x8] sm:$0x7] }
  0x36   : > { %469 = vmatpush.msra.mxu0 %v420_v4  ;;  %489 = vmatpush.msra.mxu1 %v421_v5  ;;  %v446_v17 = vld [vmem:[%s1982_s3] sm:$0x7]  ;;  %v432_v18 = vunpack.c.l.bf16 %v1637_v12  ;;  %v433_v19 = vunpack.c.h.bf16 %v1637_v12  ;;  %v1661_v20 = vld [vmem:[%s1609_s26 + $0x8] sm:$0xff]  ;;  %v430_v21 = vunpack.c.l.bf16 %v1646_v15  ;;  %v431_v22 = vunpack.c.h.bf16 %v1646_v15  ;;  %v1127_v23 = vld [vmem:[%s1983_s4 + $0x4] sm:$0x7] }
  0x37   : > { %450 = vperm.xlu0 %1232, %v447_v9   ;;  %637 = vperm.xlu1 %1233, %v1133_v16   ;;  %v1675_v24 = vld [vmem:[%s1609_s26] sm:$0xff]  ;;  %v428_v25 = vunpack.c.l.bf16 %v1661_v20  ;;  %v429_v26 = vunpack.c.h.bf16 %v1661_v20  ;;  %v1684_v27 = vld [vmem:[%s364_s11 + $0x18] sm:$0xff]  ;;  %v1695_v31 = vld [vmem:[%s364_s11 + $0x10] sm:$0xff]  ;;  %v2034_v3 = vunpack.c.h.bf16 %v1625_v8 }
  0x38   : > { %470 = vmatpush.msra.mxu0 %v418_v6  ;;  %490 = vmatpush.msra.mxu1 %v419_v7  ;;  %v426_v28 = vunpack.c.l.bf16 %v1675_v24  ;;  %v1998_v29 = vunpack.c.h.bf16 %v1675_v24  ;;  %v840_v30 = vld [vmem:[%s1985_s6] sm:$0xff]  ;;  %v444_v33 = vunpack.c.l.bf16 %v1684_v27  ;;  %v445_v34 = vunpack.c.h.bf16 %v1684_v27  ;;  %v1706_v35 = vld [vmem:[%s364_s11 + $0x8] sm:$0xff]  ;;  %v843_v38 = vld [vmem:[%s1985_s6 + $0x18] sm:$0xff] }
  0x39   : > { %v1126_v32 = vld [vmem:[%s1982_s3 + $0x4] sm:$0x7]  ;;  %v442_v36 = vunpack.c.l.bf16 %v1695_v31  ;;  %v443_v37 = vunpack.c.h.bf16 %v1695_v31  ;;  %v440_v40 = vunpack.c.l.bf16 %v1706_v35  ;;  %v441_v41 = vunpack.c.h.bf16 %v1706_v35  ;;  %v1132_v44 = vld [vmem:[%s1982_s3 + $0x8] sm:$0x7] }
  0x3a   : > { %471 = vmatpush.msra.mxu0 %v416_v10  ;;  %491 = vmatpush.msra.mxu1 %v417_v11  ;;  %v1719_v39 = vld [vmem:[%s364_s11] sm:$0xff]  ;;  %v841_v20 = vld [vmem:[%s1985_s6 + $0x8] sm:$0xff]  ;;  %s1934_s11 = scalar_lea.vmem [#allocation8], %s1599_s16  ;;  %s1154_s16 = sshll.u32 %s1435_s27, 5 }
  0x3b   : > { %v1999_v42 = vunpack.c.l.bf16 %v1719_v39  ;;  %v1997_v43 = vunpack.c.h.bf16 %v1719_v39  ;;  %v2035_v35 = vunpack.c.l.bf16 %v1719_v39  ;;  %851 = vperm.xlu2 %1234, %v841_v20   ;;  %v2037_v8 = vunpack.c.h.bf16 %v1719_v39  ;;  %v837_v39 = vld [vmem:[%s1984_s5 + $0x8] sm:$0xff]  ;;  %s964_s12 = scalar_lea.hbm %s2038_s8, %s1154_s16  ;;  %s965_s9 = sshll.u32 %s1934_s11, 4  ;;  %s966_s9 = int_to_ptr.vmem [resolvable:$true] %s965_s9 }
  0x3c   : > { %472 = vmatpush.msra.mxu0 %v414_v13  ;;  %492 = vmatpush.msra.mxu1 %v2000_v14  ;;  %s967_s10 = sshll.u32 %s964_s12, 4  ;;  %s951_s27 = scalar_lea.sflag [#allocation4], %s1596_s1  ;;  %s968_s10 = int_to_ptr.hbm [resolvable:$true] %s967_s10 }
  0x3d   : > { %1122 = vmatmul.msk.f32.vlgmr.msra.gmra.mxu0 %vm453_vm0, %v446_v17  ;;  %1123 = vmatmul.msk.f32.vlgmr.msra.gmra.mxu1 %vm453_vm0, %v446_v17  ;;  %s1371_s17 = sshra.s32 %s968_s10, 4  ;;  %s1377_s26 = scalar_lea.hbm %s2038_s8, 64  ;;  %s1372_s17 = int_to_ptr.hbm [resolvable:$true] %s1371_s17 }
  0x3e   : > { %561 = vmatpush.msrb.mxu0 %v432_v18  ;;  %581 = vmatpush.msrb.mxu1 %v433_v19  ;;  %s1373_s29 = scalar_lea.hbm %s1372_s17, 32  ;;  %p1378_p7 = scmp.lt.s32.totalorder %s1372_s17, %s2038_s8 }
  0x3f   : > { %543 = vperm.xlu0 %1232, %v1127_v23   ;;  %846 = vperm.xlu1 %1233, %v840_v30   ;;  %p1374_p4 = scmp.ne.s32.totalorder %s1372_s17, %s1373_s29  ;;  %p1379_p8 = scmp.lt.s32.totalorder %s1377_s26, %s1373_s29 }
  0x40   : > { %562 = vmatpush.msrb.mxu0 %v430_v21  ;;  %582 = vmatpush.msrb.mxu1 %v431_v22 }
  0x41   : > { %p1375_p5 = pnand %p1374_p4, %p1545_p9  ;;  %p1380_p10 = por %p1379_p8, %p1378_p7 }
  0x42   : > { %563 = vmatpush.msrb.mxu0 %v428_v25  ;;  %583 = vmatpush.msrb.mxu1 %v429_v26 }
  0x43   : > { %p1376_p6 = pneg %p1375_p5 }
  0x44   : > { %564 = vmatpush.msrb.mxu0 %v426_v28  ;;  %584 = vmatpush.msrb.mxu1 %v1998_v29 }
  0x45   : > { %1128 = vmatmul.msk.f32.vlgmr.msrb.gmra.mxu0 %vm453_vm0, %v1126_v32  ;;  %1129 = vmatmul.msk.f32.vlgmr.msrb.gmra.mxu1 %vm453_vm0, %v1126_v32  ;;  %p1381_p13 = pnand %p1380_p10, %p1376_p6 }
  0x46   : > { %655 = vmatpush.msra.mxu0 %v444_v33  ;;  %675 = vmatpush.msra.mxu1 %v445_v34 }
  0x47   : > { %861 = vperm.xlu0 %1232, %v843_v38  }
  0x48   : > { %656 = vmatpush.msra.mxu0 %v442_v36  ;;  %676 = vmatpush.msra.mxu1 %v443_v37 }
  0x4a   : > { %657 = vmatpush.msra.mxu0 %v440_v40  ;;  %677 = vmatpush.msra.mxu1 %v441_v41 }
  0x4c   : > { %658 = vmatpush.msra.mxu0 %v1999_v42  ;;  %678 = vmatpush.msra.mxu1 %v1997_v43 }
  0x4d   : > { %1134 = vmatmul.msk.f32.vlgmr.msra.gmra.mxu0 %vm453_vm0, %v1132_v44  ;;  %1135 = vmatmul.msk.f32.vlgmr.msra.gmra.mxu1 %vm453_vm0, %v1132_v44 }
  0xa9   : > { %v451_v45 = vpop.permute.xlu0 %450  ;;  %v638_v23 = vpop.permute.xlu1 %637 }
  0xb1   : > { %v544_v54 = vpop.permute.xlu0 %543 }
  0xba   : > { %v474_v46 = vpop.f32.mrf.mxu0  ;;  %v494_v47 = vpop.f32.mrf.mxu1 }
  0xbb   : > { %v475_v48 = vadd.f32 %v474_v46, %v451_v45  ;;  %v495_v49 = vadd.f32 %v494_v47, %v451_v45 }
  0xbd   : > { %v497_v50 = vmax.f32 %v475_v48, 0.0  ;;  %v498_v51 = vmax.f32 %v495_v49, 0.0 }
  0xbf   : > { %v1124_v52 = vmul.f32 -1.442695, %v497_v50  ;;  %v1125_v53 = vmul.f32 -1.442695, %v498_v51 }
  0xc1   : > { %1235 = vpow2.f32 %v1124_v52 }
  0xc2   : > { %v566_v55 = vpop.f32.mrf.mxu0  ;;  %v586_v56 = vpop.f32.mrf.mxu1  ;;  %1237 = vpow2.f32 %v1125_v53 }
  0xc3   : > { %v567_v57 = vadd.f32 %v566_v55, %v544_v54  ;;  %v587_v58 = vadd.f32 %v586_v56, %v544_v54 }
  0xc5   : > { %v589_v59 = vmax.f32 %v567_v57, 0.0  ;;  %v590_v60 = vmax.f32 %v587_v58, 0.0 }
  0xc7   : > { %v1236_v61 = vpop.eup %1235  ;;  %v1130_v62 = vmul.f32 -1.442695, %v589_v59  ;;  %v1131_v63 = vmul.f32 -1.442695, %v590_v60 }
  0xc8   : > { %v1238_v0 = vpop.eup %1237  ;;  %v505_v9 = vadd.f32 1.0, %v1236_v61 }
  0xc9   : > { %1239 = vpow2.f32 %v1130_v62  ;;  %v1746_v30 = vadd.f32 1.0, %v1238_v0 }
  0xca   : > { %v660_v16 = vpop.f32.mrf.mxu0  ;;  %v680_v17 = vpop.f32.mrf.mxu1  ;;  %1241 = vpow2.f32 %v1131_v63  ;;  %vm512_vm1 = vweird.f32 %v505_v9 }
  0xcb   : > { %v661_v32 = vadd.f32 %v660_v16, %v638_v23  ;;  %1243 = vrcp.f32 %v505_v9  ;;  %v681_v38 = vadd.f32 %v680_v17, %v638_v23  ;;  %vm527_vm2 = vweird.f32 %v1746_v30 }
  0xcc   : > { %1245 = vrcp.f32 %v1746_v30 }
  0xcd   : > { %v683_v44 = vmax.f32 %v661_v32, 0.0  ;;  %v684_v46 = vmax.f32 %v681_v38, 0.0 }
  0xcf   : > { %v1240_v45 = vpop.eup %1239  ;;  %v1136_v48 = vmul.f32 -1.442695, %v683_v44  ;;  %v1137_v52 = vmul.f32 -1.442695, %v684_v46  ;;  %v516_v44 = vand.u32 2147483647, %v505_v9 }
  0xd0   : > { %v597_v47 = vadd.f32 1.0, %v1240_v45  ;;  %v1242_v49 = vpop.eup %1241  ;;  %v518_v45 = vand.u32 2147483648, %v505_v9  ;;  %v533_v46 = vand.u32 2147483648, %v1746_v30 }
  0xd1   : > { %v1749_v50 = vpop.eup %1243  ;;  %v1751_v51 = vadd.f32 1.0, %v1242_v49  ;;  %vm1783_vm5 = vcmp.eq.f32.partialorder %v516_v44, 8.507059e+37 }
  0xd2   : > { %1247 = vrcp.f32 %v597_v47  ;;  %v1754_v53 = vpop.eup %1245  ;;  %v508_v54 = vmul.f32 %v1749_v50, %v505_v9  ;;  %vm513_vm3 = vweird.f32 %v1749_v50  ;;  %v608_v49 = vand.u32 2147483647, %v597_v47 }
  0xd3   : > { %1249 = vpow2.f32 %v1136_v48  ;;  %v523_v56 = vmul.f32 %v1754_v53, %v1746_v30  ;;  %v531_v48 = vand.u32 2147483647, %v1746_v30  ;;  %v623_v43 = vand.u32 2147483647, %v1751_v51  ;;  %vm1789_vm6 = vmor %vm512_vm1, %vm513_vm3 }
  0xd4   : > { %1251 = vrcp.f32 %v1751_v51  ;;  %v509_v59 = vsub.f32 1.0, %v508_v54  ;;  %vm528_vm7 = vweird.f32 %v1754_v53  ;;  %vm604_vm8 = vweird.f32 %v597_v47 }
  0xd5   : > { %1253 = vpow2.f32 %v1137_v52  ;;  %v524_v16 = vsub.f32 1.0, %v523_v56  ;;  %v610_v52 = vand.u32 2147483648, %v597_v47  ;;  %vm1796_vm9 = vcmp.eq.f32.partialorder %v531_v48, 8.507059e+37  ;;  %vm1835_vm3 = vmor %vm527_vm2, %vm528_vm7 }
  0xd6   : > { %v510_v17 = vmul.f32 %v1749_v50, %v509_v59  ;;  %vm1804_vm11 = vcmp.eq.f32.partialorder %v608_v49, 8.507059e+37  ;;  %vm619_vm13 = vweird.f32 %v1751_v51  ;;  %vm1818_vm14 = vcmp.eq.f32.partialorder %v623_v43, 8.507059e+37 }
  0xd7   : > { %vm725_vm7 = vcmask 1042432  }
  0xd8   : > { %v1757_v55 = vpop.eup %1247  ;;  %v511_v56 = vadd.f32 %v1749_v50, %v510_v17 }
  0xd9   : > { %v600_v57 = vmul.f32 %v1757_v55, %v597_v47  ;;  %v1250_v58 = vpop.eup %1249  ;;  %vm605_vm4 = vweird.f32 %v1757_v55 }
  0xda   : > { %v1762_v60 = vpop.eup %1251  ;;  %v1764_v62 = vadd.f32 1.0, %v1250_v58  ;;  %vm1800_vm10 = vmor %vm604_vm8, %vm605_vm4  ;;  %v515_v48 = vsel %vm1789_vm6, %v1749_v50, %v511_v56 }
  0xdb   : > { %v601_v61 = vsub.f32 1.0, %v600_v57  ;;  %v615_v63 = vmul.f32 %v1762_v60, %v1751_v51  ;;  %v1254_v0 = vpop.eup %1253  ;;  %v525_v57 = vmul.f32 %v1754_v53, %v524_v16  ;;  %v625_v16 = vand.u32 2147483648, %v1751_v51 }
  0xdc   : > { %1255 = vrcp.f32 %v1764_v62  ;;  %v1771_v38 = vadd.f32 1.0, %v1254_v0  ;;  %v534_v0 = vor.u32 1.1754944e-38, %v533_v46  ;;  %vm620_vm12 = vweird.f32 %v1762_v60 }
  0xdd   : > { %v602_v23 = vmul.f32 %v1757_v55, %v601_v61  ;;  %v616_v32 = vsub.f32 1.0, %v615_v63  ;;  %v519_v63 = vor.u32 1.1754944e-38, %v518_v45  ;;  %v611_v45 = vor.u32 1.1754944e-38, %v610_v52  ;;  %vm1824_vm15 = vmor %vm619_vm13, %vm620_vm12 }
  0xde   : > { %1257 = vrcp.f32 %v1771_v38  ;;  %v526_v29 = vadd.f32 %v1754_v53, %v525_v57  ;;  %v626_v50 = vor.u32 1.1754944e-38, %v625_v16  ;;  %vm698_vm4 = vweird.f32 %v1764_v62 }
  0xdf   : > { %v617_v54 = vmul.f32 %v1762_v60, %v616_v32  ;;  %v603_v58 = vadd.f32 %v1757_v55, %v602_v23  ;;  %v520_v51 = vsel %vm1783_vm5, %v519_v63, %v515_v48  ;;  %v719_v30 = vand.u32 2147483648, %v1771_v38 }
  0xe0   : > { %v530_v61 = vsel %vm1835_vm3, %v1754_v53, %v526_v29  ;;  %vm713_vm8 = vweird.f32 %v1771_v38 }
  0xe1   : > { %v618_v46 = vadd.f32 %v1762_v60, %v617_v54  ;;  %v607_v42 = vsel %vm1800_vm10, %v1757_v55, %v603_v58  ;;  %v704_v54 = vand.u32 2147483648, %v1764_v62  ;;  %v702_v55 = vand.u32 2147483647, %v1764_v62 }
  0xe2   : > { %v1256_v59 = vpop.eup %1255  ;;  %v612_v57 = vsel %vm1804_vm11, %v611_v45, %v607_v42  ;;  %v717_v42 = vand.u32 2147483647, %v1771_v38  ;;  %v535_v53 = vsel %vm1796_vm9, %v534_v0, %v530_v61 }
  0xe3   : > { %v694_v17 = vmul.f32 %v1256_v59, %v1764_v62  ;;  %vm699_vm1 = vweird.f32 %v1256_v59  ;;  %v622_v58 = vsel %vm1824_vm15, %v1762_v60, %v618_v46  ;;  %v629_v9 = vadd.f32 %v612_v57, %v520_v51 }
  0xe4   : > { %v1258_v47 = vpop.eup %1257  ;;  %vm700_vm2 = vmor %vm698_vm4, %vm699_vm1  ;;  %v627_v60 = vsel %vm1818_vm14, %v626_v50, %v622_v58  ;;  %vm703_vm6 = vcmp.eq.f32.partialorder %v702_v55, 8.507059e+37  ;;  %v720_v46 = vor.u32 1.1754944e-38, %v719_v30  ;;  %vm718_vm11 = vcmp.eq.f32.partialorder %v717_v42, 8.507059e+37 }
  0xe5   : > { %v695_v49 = vsub.f32 1.0, %v694_v17  ;;  %v709_v14 = vmul.f32 %v1258_v47, %v1771_v38  ;;  %v705_v17 = vor.u32 1.1754944e-38, %v704_v54  ;;  %vm714_vm5 = vweird.f32 %v1258_v47 }
  0xe6   : > { %vm715_vm10 = vmor %vm713_vm8, %vm714_vm5  ;;  %v630_v48 = vadd.f32 %v627_v60, %v535_v53 }
  0xe7   : > { %v696_v56 = vmul.f32 %v1256_v59, %v695_v49  ;;  %v710_v16 = vsub.f32 1.0, %v709_v14 }
  0xe9   : > { %v697_v63 = vadd.f32 %v1256_v59, %v696_v56  ;;  %v711_v44 = vmul.f32 %v1258_v47, %v710_v16 }
  0xeb   : > { %v701_v14 = vsel %vm700_vm2, %v1256_v59, %v697_v63  ;;  %v712_v29 = vadd.f32 %v1258_v47, %v711_v44 }
  0xec   : > { %v706_v45 = vsel %vm703_vm6, %v705_v17, %v701_v14 }
  0xed   : > { %v723_v62 = vadd.f32 %v706_v45, %v629_v9  ;;  %v716_v49 = vsel %vm715_vm10, %v1258_v47, %v712_v29 }
  0xee   : > { %v721_v52 = vsel %vm718_vm11, %v720_v46, %v716_v49 }
  0xef   : > { %v726_v54 = vsel %vm725_vm7, %v723_v62, -inf  ;;  %v724_v59 = vadd.f32 %v721_v52, %v630_v48 }
  0xf0   : > { %v727_v32 = vrot.slane %v726_v54, 4 }
  0xf1   : > { %v733_v56 = vsel %vm725_vm7, %v724_v59, -inf }
  0xf2   : > { %v728_v50 = vmax.f32 %v726_v54, %v727_v32  ;;  %v734_v55 = vrot.slane %v733_v56, 4 }
  0xf4   : > { %v729_v51 = vrot.slane %v728_v50, 2  ;;  %v735_v38 = vmax.f32 %v733_v56, %v734_v55 }
  0xf6   : > { %v730_v43 = vmax.f32 %v728_v50, %v729_v51  ;;  %v736_v23 = vrot.slane %v735_v38, 2 }
  0xf8   : > { %v731_v0 = vrot.slane %v730_v43, 1  ;;  %v737_v57 = vmax.f32 %v735_v38, %v736_v23 }
  0xfa   : > { %v732_v58 = vmax.f32 %v730_v43, %v731_v0  ;;  %v738_v16 = vrot.slane %v737_v57, 1 }
  0xfc   : > { %v740_v61 = vsub.f32 %v723_v62, %v732_v58  ;;  %v739_v47 = vmax.f32 %v737_v57, %v738_v16 }
  0xfe   : > { %v742_v63 = vmul.f32 1.442695, %v740_v61  ;;  %v741_v30 = vsub.f32 %v724_v59, %v739_v47 }
 0x100   : > { %1259 = vpow2.f32 %v742_v63  ;;  %v744_v17 = vmul.f32 1.442695, %v741_v30 }
 0x102   : > { %1261 = vpow2.f32 %v744_v17 }
 0x106   : > { %v1260_v44 = vpop.eup %1259 }
 0x107   : > { %v746_v42 = vsel %vm725_vm7, %v1260_v44, 0.0 }
 0x108   : > { %v747_v9 = vrot.slane %v746_v42, 4  ;;  %v1262_v60 = vpop.eup %1261 }
 0x109   : > { %v753_v45 = vsel %vm725_vm7, %v1262_v60, 0.0 }
 0x10a   : > { %v748_v14 = vadd.f32 %v747_v9, %v746_v42  ;;  %v754_v29 = vrot.slane %v753_v45, 4 }
 0x10c   : > { %v749_v53 = vrot.slane %v748_v14, 2  ;;  %v755_v46 = vadd.f32 %v754_v29, %v753_v45 }
 0x10e   : > { %v750_v48 = vadd.f32 %v749_v53, %v748_v14  ;;  %v756_v49 = vrot.slane %v755_v46, 2 }
 0x110   : > { %v751_v62 = vrot.slane %v750_v48, 1  ;;  %v757_v54 = vadd.f32 %v756_v49, %v755_v46 }
 0x112   : > { %v752_v52 = vadd.f32 %v751_v62, %v750_v48  ;;  %v758_v32 = vrot.slane %v757_v54, 1 }
 0x114   : > { %1263 = vrcp.f32 %v752_v52  ;;  %v759_v59 = vadd.f32 %v758_v32, %v757_v54  ;;  %v771_v38 = vand.u32 2147483648, %v752_v52  ;;  %v769_v0 = vand.u32 2147483647, %v752_v52 }
 0x115   : > { %vm765_vm12 = vweird.f32 %v752_v52 }
 0x116   : > { %1265 = vrcp.f32 %v759_v59  ;;  %v786_v16 = vand.u32 2147483648, %v759_v59  ;;  %v772_v61 = vor.u32 1.1754944e-38, %v771_v38  ;;  %v784_v63 = vand.u32 2147483647, %v759_v59 }
 0x117   : > { %vm770_vm15 = vcmp.eq.f32.partialorder %v769_v0, 8.507059e+37  ;;  %vm780_vm1 = vweird.f32 %v759_v59 }
 0x118   : > { %v787_v14 = vor.u32 1.1754944e-38, %v786_v16  ;;  %vm785_vm4 = vcmp.eq.f32.partialorder %v784_v63, 8.507059e+37  ;;  %v836_v16 = vld [vmem:[%s1984_s5] sm:$0xff]  ;;  %v839_v63 = vld [vmem:[%s1984_s5 + $0x18] sm:$0xff] }
 0x11a   : > { %v1264_v50 = vpop.eup %1263 }
 0x11b   : > { %v761_v56 = vmul.f32 %v1264_v50, %v752_v52  ;;  %vm766_vm9 = vweird.f32 %v1264_v50 }
 0x11c   : > { %v1266_v55 = vpop.eup %1265  ;;  %vm767_vm13 = vmor %vm765_vm12, %vm766_vm9 }
 0x11d   : > { %v762_v51 = vsub.f32 1.0, %v761_v56  ;;  %v776_v43 = vmul.f32 %v1266_v55, %v759_v59  ;;  %vm781_vm14 = vweird.f32 %v1266_v55 }
 0x11e   : > { %vm782_vm3 = vmor %vm780_vm1, %vm781_vm14 }
 0x11f   : > { %v763_v23 = vmul.f32 %v1264_v50, %v762_v51  ;;  %v777_v57 = vsub.f32 1.0, %v776_v43 }
 0x121   : > { %v764_v58 = vadd.f32 %v1264_v50, %v763_v23  ;;  %v778_v47 = vmul.f32 %v1266_v55, %v777_v57 }
 0x123   : > { %v768_v30 = vsel %vm767_vm13, %v1264_v50, %v764_v58  ;;  %v779_v42 = vadd.f32 %v1266_v55, %v778_v47  ;;  %v838_v47 = vld [vmem:[%s1984_s5 + $0x10] sm:$0xff] }
 0x124   : > { %v773_v17 = vsel %vm770_vm15, %v772_v61, %v768_v30  ;;  %v847_v30 = vpop.permute.xlu1 %846 }
 0x125   : > { %v774_v9 = vmul.f32 %v1260_v44, %v773_v17  ;;  %v783_v45 = vsel %vm782_vm3, %v1266_v55, %v779_v42 }
 0x126   : > { %v788_v48 = vsel %vm785_vm4, %v787_v14, %v783_v45 }
 0x127   : > { %v790_v29 = vperm.slane %v774_v9, 0  ;;  %v800_v53 = vperm.slane %v774_v9, 1  ;;  %v818_v46 = vperm.slane %v774_v9, 2  ;;  %v789_v49 = vmul.f32 %v1262_v60, %v788_v48 }
 0x129   : > { %v798_v62 = vmul.f32 %v790_v29, %v420_v4  ;;  %v808_v54 = vmul.f32 %v800_v53, %v432_v18  ;;  %v796_v52 = vmul.f32 %v790_v29, %v418_v6  ;;  %v791_v32 = vperm.slane %v789_v49, 0 }
 0x12a   : > { %v801_v44 = vperm.slane %v789_v49, 1  ;;  %v819_v59 = vperm.slane %v789_v49, 2  ;;  %v806_v50 = vmul.f32 %v800_v53, %v430_v21  ;;  %v826_v55 = vmul.f32 %v818_v46, %v444_v33 }
 0x12b   : > { %v816_v56 = vadd.f32 %v808_v54, %v798_v62  ;;  %v794_v60 = vmul.f32 %v790_v29, %v416_v10  ;;  %v804_v4 = vmul.f32 %v800_v53, %v428_v25  ;;  %v799_v18 = vmul.f32 %v791_v32, %v421_v5 }
 0x12c   : > { %v809_v6 = vmul.f32 %v801_v44, %v433_v19  ;;  %v814_v51 = vadd.f32 %v806_v50, %v796_v52  ;;  %v824_v21 = vmul.f32 %v818_v46, %v442_v36  ;;  %v827_v33 = vmul.f32 %v819_v59, %v445_v34 }
 0x12d   : > { %v834_v38 = vadd.f32 %v826_v55, %v816_v56  ;;  %v797_v10 = vmul.f32 %v791_v32, %v419_v7  ;;  %v807_v25 = vmul.f32 %v801_v44, %v431_v22  ;;  %v825_v5 = vmul.f32 %v819_v59, %v443_v37 }
 0x12e   : > { %v817_v43 = vadd.f32 %v809_v6, %v799_v18  ;;  %v832_v1 = vadd.f32 %v824_v21, %v814_v51  ;;  %v812_v12 = vadd.f32 %v804_v4, %v794_v60  ;;  %v822_v36 = vmul.f32 %v818_v46, %v440_v40  ;;  %v862_v51 = vpop.permute.xlu0 %861 }
 0x12f   : > { %888 = vmatpush.msra.mxu2 %v834_v38  ;;  %v815_v19 = vadd.f32 %v807_v25, %v797_v10  ;;  %v795_v27 = vmul.f32 %v791_v32, %v417_v11  ;;  %v805_v2 = vmul.f32 %v801_v44, %v429_v26  ;;  %v823_v15 = vmul.f32 %v819_v59, %v441_v41 }
 0x130   : > { %v835_v7 = vadd.f32 %v827_v33, %v817_v43  ;;  %v792_v22 = vmul.f32 %v790_v29, %v414_v13  ;;  %v802_v31 = vmul.f32 %v800_v53, %v426_v28  ;;  %v830_v37 = vadd.f32 %v822_v36, %v812_v12  ;;  %v852_v29 = vpop.permute.xlu2 %851 }
 0x131   : > { %889 = vmatpush.msra.mxu2 %v832_v1  ;;  %v833_v34 = vadd.f32 %v825_v5, %v815_v19  ;;  %v813_v40 = vadd.f32 %v805_v2, %v795_v27  ;;  %v793_v11 = vmul.f32 %v791_v32, %v2034_v3  ;;  %v820_v41 = vmul.f32 %v818_v46, %v2035_v35 }
 0x132   : > { %917 = vmatpush.msra.mxu3 %v835_v7  ;;  %v810_v26 = vadd.f32 %v802_v31, %v792_v22  ;;  %v2036_v13 = vunpack.c.h.bf16 %v1675_v24  ;;  %v821_v58 = vmul.f32 %v819_v59, %v2037_v8  ;;  %v842_v24 = vld [vmem:[%s1985_s6 + $0x10] sm:$0xff] }
 0x133   : > { %890 = vmatpush.msra.mxu2 %v830_v37  ;;  %v831_v28 = vadd.f32 %v823_v15, %v813_v40  ;;  %856 = vperm.xlu2 %1234, %v842_v24  }
 0x134   : > { %v803_v23 = vmul.f32 %v801_v44, %v2036_v13  ;;  %918 = vmatpush.msra.mxu3 %v833_v34  ;;  %v828_v0 = vadd.f32 %v820_v41, %v810_v26 }
 0x136   : > { %v811_v57 = vadd.f32 %v803_v23, %v793_v11  ;;  %919 = vmatpush.msra.mxu3 %v831_v28  ;;  %891 = vmatpush.msra.mxu2 %v828_v0 }
 0x137   : > { %1138 = vmatmul.msk.f32.vlgmr.msra.gmra.mxu2 %vm453_vm0, %v836_v16 }
 0x138   : > { %v829_v61 = vadd.f32 %v821_v58, %v811_v57 }
 0x13a   : > { %920 = vmatpush.msra.mxu3 %v829_v61 }
 0x13b   : > { %1142 = vmatmul.msk.f32.vlgmr.msra.gmra.mxu3 %vm453_vm0, %v836_v16 }
 0x13f   : > { %1139 = vmatmul.msk.f32.gmra.mxu2 %vm453_vm0, %v837_v39 }
 0x143   : > { %1143 = vmatmul.msk.f32.gmra.mxu3 %vm453_vm0, %v837_v39 }
 0x147   : > { %1140 = vmatmul.msk.f32.gmra.mxu2 %vm453_vm0, %v838_v47 }
 0x14b   : > { %1144 = vmatmul.msk.f32.gmra.mxu3 %vm453_vm0, %v838_v47 }
 0x14f   : > { %1141 = vmatmul.msk.f32.gmra.mxu2 %vm453_vm0, %v839_v63 }
 0x153   : > { %1145 = vmatmul.msk.f32.gmra.mxu3 %vm453_vm0, %v839_v63 }
 0x18d   : > { %v857_v44 = vpop.permute.xlu2 %856 }
 0x1ba   : > { %v893_v17 = vpop.f32.mrf.mxu2 }
 0x1bb   : > { %v894_v42 = vadd.f32 %v893_v17, %v847_v30 }
 0x1bd   : > { %v934_v14 = vmax.f32 %v894_v42, 0.0 }
 0x1be   : > { %v922_v9 = vpop.f32.mrf.mxu3 }
 0x1bf   : > { %v923_v45 = vadd.f32 %v922_v9, %v847_v30 }
 0x1c1   : > { %v935_v53 = vmax.f32 %v923_v45, 0.0 }
 0x1c2   : > { %v896_v48 = vpop.f32.mrf.mxu2 }
 0x1c3   : > { %v942_v46 = vpack.c.bf16 %v935_v53, %v934_v14  ;;  %v897_v49 = vadd.f32 %v896_v48, %v852_v29 }
 0x1c5   : > { %946 = vst [vmem:[%s1934_s11] sm:$0xff] %v942_v46  ;;  %v936_v54 = vmax.f32 %v897_v49, 0.0 }
 0x1c6   : > { %v925_v62 = vpop.f32.mrf.mxu3 }
 0x1c7   : > { %v926_v52 = vadd.f32 %v925_v62, %v852_v29 }
 0x1c9   : > { %v937_v32 = vmax.f32 %v926_v52, 0.0 }
 0x1ca   : > { %v899_v50 = vpop.f32.mrf.mxu2 }
 0x1cb   : > { %v943_v59 = vpack.c.bf16 %v937_v32, %v936_v54  ;;  %v900_v56 = vadd.f32 %v899_v50, %v857_v44 }
 0x1cd   : > { %947 = vst [vmem:[%s1934_s11 + $0x8] sm:$0xff] %v943_v59  ;;  %v938_v60 = vmax.f32 %v900_v56, 0.0 }
 0x1ce   : > { %v928_v55 = vpop.f32.mrf.mxu3 }
 0x1cf   : > { %v929_v4 = vadd.f32 %v928_v55, %v857_v44 }
 0x1d1   : > { %v939_v18 = vmax.f32 %v929_v4, 0.0 }
 0x1d2   : > { %v902_v21 = vpop.f32.mrf.mxu2 }
 0x1d3   : > { %v944_v6 = vpack.c.bf16 %v939_v18, %v938_v60  ;;  %v903_v38 = vadd.f32 %v902_v21, %v862_v51 }
 0x1d5   : > { %948 = vst [vmem:[%s1934_s11 + $0x10] sm:$0xff] %v944_v6  ;;  %v940_v10 = vmax.f32 %v903_v38, 0.0 }
 0x1d6   : > { %v931_v33 = vpop.f32.mrf.mxu3 }
 0x1d7   : > { %v932_v25 = vadd.f32 %v931_v33, %v862_v51 }
 0x1d9   : > { %v941_v43 = vmax.f32 %v932_v25, 0.0 }
 0x1db   : > { %v945_v1 = vpack.c.bf16 %v941_v43, %v940_v10 }
 0x1dd   : > { %949 = vst [vmem:[%s1934_s11 + $0x18] sm:$0xff] %v945_v1 }
 0x1de   : > { %1384 = shalt.err (!%p1381_p13)
}
 0x1df   : > { %s1448_s1 = smov 128   ;;  %s1449_s13 = smov 8  }
 0x1e0   : > { %1161 = dma.vmem_to_hbm [thread:$0]  (%p1545_p9), %s966_s9, 512, %s968_s10, %s951_s27, %s1448_s1, %s1448_s1, %s1449_s13  }
 0x1e1 PF: > { %s2040_s14 = sld [smem:[#allocation12_spill]]  ;;  %p1174_p0 = pnand %p1107_p12, %p1552_p11 }
 0x1e2   : > { %s2042_s18 = sld [smem:[#allocation15_spill]] }
 0x1e3   : > { %p1175_p1 = pneg %p1174_p0 }
 0x1e7   : > { %s982_s19 = sand.u32 1, %s2040_s14  }
 0x1e8   : > { %s983_s20 = scalar_lea.sflag [#allocation4], %s982_s19 }
 0x1e9   : > { %1418 = dma.done.wait (%p1175_p1), %s983_s20, 512  }
 0x1ea   : > { %1420 = vsyncadd (%p1175_p1), %s983_s20, 4294966784  ;;  %s26_s29 = sadd.s32 1, %s2042_s18   ;;  %s2043_s11 = sld [smem:[#allocation13_spill]] }
 0x1eb   : > { %p23_p2 = scmp.ge.s32.totalorder %s26_s29, 4   ;;  %s2044_s26 = sld [smem:[#allocation18_spill]] }
 0x1ec   : > { %s2045_s27 = sld [smem:[#allocation14_spill]]  ;;  %s2047_s24 = smov %s1427_s25 }
 0x1ed   : > { %s2046_s28 = sld [smem:[#allocation16_spill]]  ;;  %25 = sbr.rel (!%p23_p2) target bundleno = 11 (0xb), region = 121 }
 0x1f0   : > { %s2048_s25 = smov %s2043_s11 }
 0x1f2   :  { %989 = vsyncpa [#allocation3], 1 }
 0x1f3   :  { %991 = vsyncpa [#allocation3 + $0x1], 1 }
 0x1f4   :  { %992 = vsyncpa [#allocation6], 1 }
 0x1f5   :  { %994 = vsyncpa [#allocation6 + $0x1], 1 }
 0x1f6   :  { %995 = vsyncpa [#allocation4], 1 }
 0x1f7   :  { %997 = vsyncpa [#allocation4 + $0x1], 1 }

</bundles_post_ra>
